<compile_context>
chip_gen: v7x
topology: tpu7x:2x2x1
jax: 0.10.0
libtpu: 0.0.40
codegen_flags: <defaults>
</compile_context>

<pallas_src>
import jax
import jax.numpy as jnp
from jax.experimental import pallas as pl
from jax.experimental.pallas import tpu as pltpu


def _round_up(n, m):
    return ((n + m - 1) // m) * m


def mlp_kernel(x_ref, w1_ref, b1_ref, w2_ref, b2_ref, w3_ref, b3_ref, o_ref):
    # fc1 + ReLU  (MXU matmul, VPU max)
    h1 = jnp.dot(x_ref[...], w1_ref[...], preferred_element_type=jnp.float32)
    h1 = jnp.maximum(h1 + b1_ref[...], 0.0)
    # fc2 + ReLU
    h2 = jnp.dot(h1, w2_ref[...], preferred_element_type=jnp.float32)
    h2 = jnp.maximum(h2 + b2_ref[...], 0.0)
    # fc3 + tanh  (tanh goes to the EUP)
    h3 = jnp.dot(h2, w3_ref[...], preferred_element_type=jnp.float32)
    o_ref[...] = jnp.tanh(h3 + b3_ref[...])


def net_forward(x, w1, b1, w2, b2, w3, b3, *, block_batch=1024):
    """x: [batch, input_dim]; weights stored [in, out] (== torch W.T), biases [1, out]."""
    batch, in_dim = x.shape
    h1_dim, h2_dim, out_dim = w1.shape[1], w2.shape[1], w3.shape[1]

    # Batch tile: multiple of 8 (lowering rule), capped by block_batch.
    tb = _round_up(min(block_batch, batch), 8)
    # For large batches keep >= 2 grid tiles so both v7x TensorCores get work.
    if batch >= 1024 and -(-batch // tb) < 2:
        tb = _round_up(-(-batch // 2), 8)
    padded_batch = _round_up(batch, tb)

    # Only the batch dimension is ever padded; feature dims are full-dim blocks.
    xp = x if padded_batch == batch else jnp.pad(x, ((0, padded_batch - batch), (0, 0)))

    grid = (padded_batch // tb,)
    x_spec = pl.BlockSpec((tb, in_dim), lambda i: (i, 0))
    out_spec = pl.BlockSpec((tb, out_dim), lambda i: (i, 0))

    def resident(shape):
        # Same block for every grid step -> stays in VMEM across the grid.
        return pl.BlockSpec(shape, lambda i: (0, 0))

    param_bytes = 4 * (w1.size + b1.size + w2.size + b2.size + w3.size + b3.size)
    cost = pl.CostEstimate(
        flops=2 * padded_batch * (in_dim * h1_dim + h1_dim * h2_dim + h2_dim * out_dim),
        transcendentals=padded_batch * out_dim,
        bytes_accessed=4 * padded_batch * (in_dim + out_dim) + param_bytes,
    )

    out_padded = pl.pallas_call(
        mlp_kernel,
        out_shape=jax.ShapeDtypeStruct((padded_batch, out_dim), jnp.float32),
        grid_spec=pltpu.PrefetchScalarGridSpec(
            num_scalar_prefetch=0,
            grid=grid,
            in_specs=[
                x_spec,
                resident((in_dim, h1_dim)), resident((1, h1_dim)),
                resident((h1_dim, h2_dim)), resident((1, h2_dim)),
                resident((h2_dim, out_dim)), resident((1, out_dim)),
            ],
            out_specs=out_spec,
        ),
        compiler_params=pltpu.CompilerParams(
            dimension_semantics=(pltpu.PARALLEL,),   # megacore: shard batch tiles
            vmem_limit_bytes=32 * 1024 * 1024,       # safe on v5e/v6e/v7x (64 MiB)
        ),
        cost_estimate=cost,
    )(xp, w1, b1, w2, b2, w3, b3)

    # Slice away only the batch padding (feature dims were never padded).
    return out_padded[:batch]


def init_params(key, input_dim):
    """Deterministic synthetic parameters matching Net(input_dim) shapes."""
    ks = jax.random.split(key, 6)
    # torch Linear: weight (out, in); here stored transposed as (in, out).
    w1 = jax.random.normal(ks[0], (input_dim, 64), jnp.float32) * 0.1
    b1 = jax.random.normal(ks[1], (1, 64), jnp.float32) * 0.1
    w2 = jax.random.normal(ks[2], (64, 32), jnp.float32) * 0.1
    b2 = jax.random.normal(ks[3], (1, 32), jnp.float32) * 0.1
    w3 = jax.random.normal(ks[4], (32, 2), jnp.float32) * 0.1
    b3 = jax.random.normal(ks[5], (1, 2), jnp.float32) * 0.1
    return w1, b1, w2, b2, w3, b3


def _reference(x, w1, b1, w2, b2, w3, b3):
    h = jnp.maximum(x @ w1 + b1, 0.0)
    h = jnp.maximum(h @ w2 + b2, 0.0)
    return jnp.tanh(h @ w3 + b3)


if __name__ == "__main__":
    key = jax.random.PRNGKey(0)
    k_x, k_xl, k_p = jax.random.split(key, 3)

    input_dim = 16
    params = init_params(k_p, input_dim)
    fwd = jax.jit(net_forward, static_argnames="block_batch")

    # Small-shape check (single grid step).
    batch = 8
    x = jax.random.normal(k_x, (batch, input_dim), jnp.float32)
    out = jax.block_until_ready(fwd(x, *params))
    ref = _reference(x, *params)
    assert out.shape == (batch, 2)
    assert jnp.allclose(out, ref, atol=1e-5, rtol=1e-5)

    # Larger batch exercises the pipelined, multi-tile (megacore-parallel) path.
    batch_l = 2048
    xl = jax.random.normal(k_xl, (batch_l, input_dim), jnp.float32)
    out_l = jax.block_until_ready(fwd(xl, *params))
    ref_l = _reference(xl, *params)
    assert out_l.shape == (batch_l, 2)
    assert jnp.allclose(out_l, ref_l, atol=1e-5, rtol=1e-5)

    print("KERNEL_OK")
</pallas_src>

<mosaic_0001>
module attributes {stable_mosaic.version = 11 : i64} {
  func.func @mlp_kernel(%arg0: i32, %arg1: memref<8x16xf32, #tpu.memory_space<vmem>>, %arg2: memref<16x64xf32, #tpu.memory_space<vmem>>, %arg3: memref<1x64xf32, #tpu.memory_space<vmem>>, %arg4: memref<64x32xf32, #tpu.memory_space<vmem>>, %arg5: memref<1x32xf32, #tpu.memory_space<vmem>>, %arg6: memref<32x2xf32, #tpu.memory_space<vmem>>, %arg7: memref<1x2xf32, #tpu.memory_space<vmem>>, %arg8: memref<8x2xf32, #tpu.memory_space<vmem>>) attributes {dimension_semantics = [#tpu.dimension_semantics<parallel>], iteration_bounds = array<i64: 1>, scalar_prefetch = 0 : i64, scratch_operands = 0 : i64, tpu.core_type = #tpu.core_type<tc>, window_params = [{transform_indices = @transform_0, window_bounds = array<i64: 8, 16>}, {pipeline_mode = #tpu.pipeline_mode<synchronous>, transform_indices = @transform_1, window_bounds = array<i64: 16, 64>}, {pipeline_mode = #tpu.pipeline_mode<synchronous>, transform_indices = @transform_2, window_bounds = array<i64: 1, 64>}, {pipeline_mode = #tpu.pipeline_mode<synchronous>, transform_indices = @transform_3, window_bounds = array<i64: 64, 32>}, {pipeline_mode = #tpu.pipeline_mode<synchronous>, transform_indices = @transform_4, window_bounds = array<i64: 1, 32>}, {pipeline_mode = #tpu.pipeline_mode<synchronous>, transform_indices = @transform_5, window_bounds = array<i64: 32, 2>}, {pipeline_mode = #tpu.pipeline_mode<synchronous>, transform_indices = @transform_6, window_bounds = array<i64: 1, 2>}, {transform_indices = @transform_7, window_bounds = array<i64: 8, 2>}]} {
    %c0 = arith.constant 0 : index
    %c0_0 = arith.constant 0 : index
    %0 = vector.load %arg1[%c0, %c0_0] : memref<8x16xf32, #tpu.memory_space<vmem>>, vector<8x16xf32>
    %c0_1 = arith.constant 0 : index
    %c0_2 = arith.constant 0 : index
    %1 = vector.load %arg2[%c0_1, %c0_2] : memref<16x64xf32, #tpu.memory_space<vmem>>, vector<16x64xf32>
    %cst = arith.constant dense<0.000000e+00> : vector<8x64xf32>
    %2 = tpu.matmul %0, %1, %cst {dimension_numbers = #tpu.dot_dimension_numbers<[1], [0], [0], [1], [0, 0, 1, 1], [], []>} : vector<8x16xf32>, vector<16x64xf32>, vector<8x64xf32> -> vector<8x64xf32>
    %c0_3 = arith.constant 0 : index
    %c0_4 = arith.constant 0 : index
    %3 = vector.load %arg3[%c0_3, %c0_4] : memref<1x64xf32, #tpu.memory_space<vmem>>, vector<1x64xf32>
    %4 = vector.broadcast %3 : vector<1x64xf32> to vector<8x64xf32>
    %5 = arith.addf %2, %4 : vector<8x64xf32>
    %cst_5 = arith.constant 0.000000e+00 : f32
    %6 = vector.broadcast %cst_5 : f32 to vector<8x64xf32>
    %7 = arith.maximumf %5, %6 : vector<8x64xf32>
    %c0_6 = arith.constant 0 : index
    %c0_7 = arith.constant 0 : index
    %8 = vector.load %arg4[%c0_6, %c0_7] : memref<64x32xf32, #tpu.memory_space<vmem>>, vector<64x32xf32>
    %cst_8 = arith.constant dense<0.000000e+00> : vector<8x32xf32>
    %9 = tpu.matmul %7, %8, %cst_8 {dimension_numbers = #tpu.dot_dimension_numbers<[1], [0], [0], [1], [0, 0, 1, 1], [], []>} : vector<8x64xf32>, vector<64x32xf32>, vector<8x32xf32> -> vector<8x32xf32>
    %c0_9 = arith.constant 0 : index
    %c0_10 = arith.constant 0 : index
    %10 = vector.load %arg5[%c0_9, %c0_10] : memref<1x32xf32, #tpu.memory_space<vmem>>, vector<1x32xf32>
    %11 = vector.broadcast %10 : vector<1x32xf32> to vector<8x32xf32>
    %12 = arith.addf %9, %11 : vector<8x32xf32>
    %cst_11 = arith.constant 0.000000e+00 : f32
    %13 = vector.broadcast %cst_11 : f32 to vector<8x32xf32>
    %14 = arith.maximumf %12, %13 : vector<8x32xf32>
    %c0_12 = arith.constant 0 : index
    %c0_13 = arith.constant 0 : index
    %15 = vector.load %arg6[%c0_12, %c0_13] : memref<32x2xf32, #tpu.memory_space<vmem>>, vector<32x2xf32>
    %cst_14 = arith.constant dense<0.000000e+00> : vector<8x2xf32>
    %16 = tpu.matmul %14, %15, %cst_14 {dimension_numbers = #tpu.dot_dimension_numbers<[1], [0], [0], [1], [0, 0, 1, 1], [], []>} : vector<8x32xf32>, vector<32x2xf32>, vector<8x2xf32> -> vector<8x2xf32>
    %c0_15 = arith.constant 0 : index
    %c0_16 = arith.constant 0 : index
    %17 = vector.load %arg7[%c0_15, %c0_16] : memref<1x2xf32, #tpu.memory_space<vmem>>, vector<1x2xf32>
    %18 = vector.broadcast %17 : vector<1x2xf32> to vector<8x2xf32>
    %19 = arith.addf %16, %18 : vector<8x2xf32>
    %20 = math.tanh %19 : vector<8x2xf32>
    %c0_17 = arith.constant 0 : index
    %c0_18 = arith.constant 0 : index
    %21 = vector.load %arg8[%c0_17, %c0_18] : memref<8x2xf32, #tpu.memory_space<vmem>>, vector<8x2xf32>
    tpu.vector_store %arg8[%c0_17, %c0_18], %20 {strides = array<i32>} : memref<8x2xf32, #tpu.memory_space<vmem>>, vector<8x2xf32>,
    return
  }
  func.func @transform_0(%arg0: i32) -> (i32, i32) {
    %c0_i32 = arith.constant 0 : i32
    %c0_i32_0 = arith.constant 0 : i32
    return %arg0, %c0_i32 : i32, i32
  }
  func.func @transform_1(%arg0: i32) -> (i32, i32) {
    %c0_i32 = arith.constant 0 : i32
    %c0_i32_0 = arith.constant 0 : i32
    %c0_i32_1 = arith.constant 0 : i32
    return %c0_i32, %c0_i32_0 : i32, i32
  }
  func.func @transform_2(%arg0: i32) -> (i32, i32) {
    %c0_i32 = arith.constant 0 : i32
    %c0_i32_0 = arith.constant 0 : i32
    %c0_i32_1 = arith.constant 0 : i32
    return %c0_i32, %c0_i32_0 : i32, i32
  }
  func.func @transform_3(%arg0: i32) -> (i32, i32) {
    %c0_i32 = arith.constant 0 : i32
    %c0_i32_0 = arith.constant 0 : i32
    %c0_i32_1 = arith.constant 0 : i32
    return %c0_i32, %c0_i32_0 : i32, i32
  }
  func.func @transform_4(%arg0: i32) -> (i32, i32) {
    %c0_i32 = arith.constant 0 : i32
    %c0_i32_0 = arith.constant 0 : i32
    %c0_i32_1 = arith.constant 0 : i32
    return %c0_i32, %c0_i32_0 : i32, i32
  }
  func.func @transform_5(%arg0: i32) -> (i32, i32) {
    %c0_i32 = arith.constant 0 : i32
    %c0_i32_0 = arith.constant 0 : i32
    %c0_i32_1 = arith.constant 0 : i32
    return %c0_i32, %c0_i32_0 : i32, i32
  }
  func.func @transform_6(%arg0: i32) -> (i32, i32) {
    %c0_i32 = arith.constant 0 : i32
    %c0_i32_0 = arith.constant 0 : i32
    %c0_i32_1 = arith.constant 0 : i32
    return %c0_i32, %c0_i32_0 : i32, i32
  }
  func.func @transform_7(%arg0: i32) -> (i32, i32) {
    %c0_i32 = arith.constant 0 : i32
    %c0_i32_0 = arith.constant 0 : i32
    return %arg0, %c0_i32 : i32, i32
  }
}

</mosaic_0001>

<bundles_post_ra>
// kernel: net_forward.1
= control target key start
LH: loop header
LB: loop body
LE: loop exit
PB: predicated region body
PF: predicated region fallthrough
CT: control target
= control target key end

     0   :  { %v379_v0 = vmov 0.0|0.0   ;;  %vm380_vm0 = vmmov 0   ;;  %v381_v3 = vmov 0.0   ;;  %vm36_vm1 = vcmask 130048   ;;  %s482_s1 = inlined_call_operand.vmem [shape: f32[16,64], index: 1, kind: input, shape index: {}]   ;;  %s483_s3 = inlined_call_operand.vmem [shape: f32[64,32], index: 3, kind: input, shape index: {}]   ;;  %s484_s0 = inlined_call_operand.vmem [shape: f32[8,16], index: 0, kind: input, shape index: {}]   ;;  %s485_s5 = inlined_call_operand.vmem [shape: f32[32,2], index: 5, kind: input, shape index: {}]   ;;  %s486_s2 = inlined_call_operand.vmem [shape: f32[1,64], index: 2, kind: input, shape index: {}]   ;;  %s487_s4 = inlined_call_operand.vmem [shape: f32[1,32], index: 4, kind: input, shape index: {}]   ;;  %s488_s6 = inlined_call_operand.vmem [shape: f32[1,2], index: 6, kind: input, shape index: {}]   ;;  %s489_s7 = inlined_call_operand.vmem [shape: f32[8,2], index: 7, kind: output, shape index: {}]  }
   0x1   :  { %353 = vmatprep.subr.bf16.mxu0 %v379_v0  ;;  %v27_v1 = vld [vmem:[%s482_s1] sm:$0xff]  ;;  %v28_v2 = vld [vmem:[%s482_s1 + $0x8] sm:$0xff]  ;;  %320 = vmatprep.mubr.msk.f32.mxu0 %vm380_vm0, %v381_v3  ;;  %v113_v7 = vld [vmem:[%s483_s3 + $0x10] sm:$0xff]  ;;  %vm126_vm2 = vcmask 523264   ;;  %vm212_vm3 = vcmask 261120   ;;  %vm287_vm4 = vcmask 15360  }
   0x2   :  { %v354_v4 = vpack.c.bf16 %v28_v2, %v27_v1  ;;  %356 = vmatprep.subr.bf16.mxu1 %v379_v0  ;;  %v111_v5 = vld [vmem:[%s483_s3] sm:$0xff]  ;;  %v112_v6 = vld [vmem:[%s483_s3 + $0x8] sm:$0xff]  ;;  %339 = vmatprep.mubr.msk.f32.mxu1 %vm380_vm0, %v381_v3  ;;  %v114_v9 = vld [vmem:[%s483_s3 + $0x18] sm:$0xff] }
   0x3   :  { %v357_v8 = vpack.c.bf16 %v112_v6, %v111_v5  ;;  %v26_v10 = vld [vmem:[%s484_s0] sm:$0xff]  ;;  %v360_v11 = vpack.c.bf16 %v114_v9, %v113_v7  ;;  %v116_v13 = vld [vmem:[%s483_s3 + $0x28] sm:$0xff]  ;;  %v117_v15 = vld [vmem:[%s483_s3 + $0x30] sm:$0xff] }
   0x4   :  { %355 = vmatpush3.bf16.msra.mxu0 %v354_v4  ;;  %v115_v12 = vld [vmem:[%s483_s3 + $0x20] sm:$0xff]  ;;  %v118_v16 = vld [vmem:[%s483_s3 + $0x38] sm:$0xff]  ;;  %v202_v19 = vld [vmem:[%s485_s5 + $0x8] sm:$0xff] }
   0x5   :  { %358 = vmatpush3.bf16.msra.mxu1 %v357_v8  ;;  %368 = vmatprep.subr.bf16.mxu0 %v379_v0  ;;  %v363_v14 = vpack.c.bf16 %v116_v13, %v115_v12  ;;  %v366_v17 = vpack.c.bf16 %v118_v16, %v117_v15  ;;  %v201_v18 = vld [vmem:[%s485_s5] sm:$0xff]  ;;  %v203_v26 = vld [vmem:[%s485_s5 + $0x10] sm:$0xff]  ;;  %v204_v27 = vld [vmem:[%s485_s5 + $0x18] sm:$0xff] }
   0x6   :  { %359 = vmatprep.subr.bf16.mxu1 %v379_v0  ;;  %v369_v20 = vpack.c.bf16 %v202_v19, %v201_v18  ;;  %v293_v21 = vld [vmem:[%s486_s2] ss:$0 sm:$0xff]  ;;  %v372_v28 = vpack.c.bf16 %v204_v27, %v203_v26 }
   0x7   :  { %321 = vmatmul.mubr.msk.f32.vlgmr.msra.gmra.mrb[0].mxu0 %vm36_vm1, %v26_v10  ;;  %v295_v29 = vld [vmem:[%s487_s4] ss:$0 sm:$0xff] }
   0x8   :  { %350 = vmatprep.mubr.msk.f32.mxu0 %vm380_vm0, %v381_v3  ;;  %370 = vmatpush3.bf16.msra.mxu0 %v369_v20  ;;  %v297_v34 = vld [vmem:[%s488_s6] ss:$0 sm:$0xff] }
   0x9   :  { %361 = vmatpush3.bf16.msra.mxu1 %v360_v11  ;;  %371 = vmatprep.subr.bf16.mxu0 %v379_v0 }
   0xa   :  { %362 = vmatprep.subr.bf16.mxu1 %v379_v0 }
   0xc   :  { %373 = vmatpush3.bf16.msra.mxu0 %v372_v28 }
   0xd   :  { %364 = vmatpush3.bf16.msra.mxu1 %v363_v14 }
   0xe   :  { %365 = vmatprep.subr.bf16.mxu1 %v379_v0 }
  0x11   :  { %367 = vmatpush3.bf16.msra.mxu1 %v366_v17 }
  0xda   :  { %v106_v22 = vpop.f32.mrb[0].mxu0 }
  0xdb   :  { %v107_v23 = vadd.f32 %v293_v21, %v106_v22  ;;  %v322_v24 = vpop.f32.mrb[1].mxu0 }
  0xdd   :  { %v110_v25 = vmax.f32 %v107_v23, 0.0 }
  0xdf   :  { %340 = vmatmul.mubr.msk.f32.vlgmr.msra.gmra.mrb[0].mxu1 %vm126_vm2, %v110_v25 }
 0x1b2   :  { %v196_v30 = vpop.f32.mrb[0].mxu1 }
 0x1b3   :  { %v197_v31 = vadd.f32 %v295_v29, %v196_v30  ;;  %v341_v32 = vpop.f32.mrb[1].mxu1 }
 0x1b5   :  { %v200_v33 = vmax.f32 %v197_v31, 0.0 }
 0x1b7   :  { %351 = vmatmul.mubr.msk.f32.vlgmr.msra.gmra.mrb[2].mxu0 %vm212_vm3, %v200_v33 }
 0x28a   :  { %v282_v35 = vpop.f32.mrb[2].mxu0 }
 0x28b   :  { %v283_v36 = vadd.f32 %v297_v34, %v282_v35  ;;  %v352_v37 = vpop.f32.mrb[3].mxu0 }
 0x28d   :  { %377 = vtanh.f32 %v283_v36 }
 0x297   :  { %v378_v38 = vpop.eup %377 }
 0x298   :  { %288 = vst.msk [vmem:[%s489_s7] sm:$0xff] %vm287_vm4, %v378_v38 }

</bundles_post_ra>
